<compile_context>
chip_gen: v5e
topology: v5e:2x2
jax: 0.10.0
libtpu: 0.0.40
codegen_flags: <defaults>
</compile_context>

<pallas_src>
import math
import functools

import jax
import jax.numpy as jnp
import numpy as np
from jax.experimental import pallas as pl
from jax.experimental.pallas import tpu as pltpu

_INV_SQRT2 = 1.0 / math.sqrt(2.0)
_LN_EPS = 1e-5                      # PyTorch nn.LayerNorm default eps


# ---------------------------------------------------------------------------
# Hardware-aware sizing helpers
# ---------------------------------------------------------------------------
@functools.lru_cache(maxsize=None)
def _vmem_limit_bytes():
    """3/4 of physical VMEM: ~48 MiB on v7x (64 MiB), ~96 MiB on v5e/v6e (128 MiB)."""
    cap = 64 * 1024 * 1024
    try:
        info = pltpu.get_tpu_info()
        cap = int(getattr(info, "vmem_capacity_bytes", cap))
    except Exception:
        pass
    cap = max(cap, 32 * 1024 * 1024)
    return int(cap * 3 // 4)


def _pick_row_tile(B, cap=256):
    """Row-block size: full B if small, else the largest multiple of 8 <= cap
    that evenly divides B (sublane-aligned), else fall back to a single block."""
    if B <= cap:
        return B
    for tb in range(cap - cap % 8, 7, -8):
        if B % tb == 0:
            return tb
    return B


def _pick_vocab_tile(Vp, H, target_bytes):
    """Lane-dense vocab tile: a multiple of 128 evenly dividing the padded vocab,
    sized so one bf16 weight tile is ~target_bytes, preferring >= 8 tiles so the
    'parallel' vocab axis load-balances across v7x's two TensorCores."""
    assert Vp % 128 == 0, Vp
    max_tn = max(128, (target_bytes // (2 * H)) // 128 * 128)
    tn = min(Vp, max_tn)
    while Vp % tn != 0:
        tn -= 128
    # Prefer a tile count >= 8 when the padded vocab allows it.
    while tn > 128 and (Vp // tn) < 8:
        cand = tn - 128
        while cand >= 128 and Vp % cand != 0:
            cand -= 128
        if cand < 128:
            break
        tn = cand
    return tn


# ---------------------------------------------------------------------------
# Shared in-kernel compute: dense -> dropout(identity) -> exact gelu -> LayerNorm
# ---------------------------------------------------------------------------
def _hidden_from_features(x, w1, b1, gamma, beta):
    # bf16 operands on the MXU, f32 accumulation; everything else in f32.
    h = jnp.dot(x.astype(jnp.bfloat16), w1,
                preferred_element_type=jnp.float32) + b1
    # Dropout(p=0.5) -> identity (eval mode).
    # exact gelu (module spec): x * 0.5 * (1 + erf(x / sqrt(2)))
    h = h * 0.5 * (1.0 + jax.lax.erf(h * _INV_SQRT2))
    mean = jnp.mean(h, axis=-1, keepdims=True)
    centered = h - mean
    var = jnp.mean(centered * centered, axis=-1, keepdims=True)
    h = centered * jax.lax.rsqrt(var + _LN_EPS)
    return h * gamma + beta


# ---------------------------------------------------------------------------
# Kernel 1 (primary path): fused head computing only the C gathered scores.
# Tiled over row blocks TB; weights resident.
# ---------------------------------------------------------------------------
def _fused_gathered_head_kernel(x_ref, w1_ref, b1_ref, gamma_ref, beta_ref,
                                w2gt_ref, b2gt_ref, out_ref):
    # x:    [TB, H]    f32
    # w1:   [H, H]     bf16  (dense weight, [in, out]) -- resident
    # b1/gamma/beta: [1, H] f32 -- resident
    # w2gt: [C, TB, H] bf16  (per-example gathered decoder rows, choice-major)
    # b2gt: [C, TB, 1] f32
    # out:  [C, TB, 1] f32
    h = _hidden_from_features(x_ref[...], w1_ref[...], b1_ref[...],
                              gamma_ref[...], beta_ref[...])          # [TB, H] f32
    w2gt = w2gt_ref[...].astype(jnp.float32)                          # [C, TB, H]
    # scores[c, b] = <h[b, :], w2gt[c, b, :]>.  C is tiny (multiple choice), so
    # a VPU multiply + lane reduction beats an M=1 batched MXU matmul.
    out_ref[...] = jnp.sum(w2gt * h, axis=-1, keepdims=True) + b2gt_ref[...]


def lm_head_prediction_scores(features, choices_ids, params, row_tile=None):
    """[B, H] features + [B, C] choice ids -> [B, C] scores.

    Never materializes the [B, V] logits: decoder FLOPs and W2 HBM traffic are
    reduced by a factor of V / C.
    """
    B, H = features.shape
    C = choices_ids.shape[1]
    TB = _pick_row_tile(B) if row_tile is None else row_tile
    assert B % TB == 0, (B, TB)

    ids_t = choices_ids.T                                             # [C, B]
    # NOTE: jnp.take clamps out-of-range ids under jit (torch.gather would raise).
    w2gt = jnp.take(params["decoder_w"], ids_t, axis=0)               # [C, B, H] bf16
    b2gt = jnp.take(params["lm_bias"], ids_t, axis=0)[..., None]      # [C, B, 1] f32

    vmem_limit = _vmem_limit_bytes()
    cost = pl.CostEstimate(
        flops=2 * B * H * H + 2 * B * C * H + 12 * B * H,
        transcendentals=B * H,
        bytes_accessed=(H * H + C * B * H) * 2 + (B * H + 3 * H + 2 * C * B) * 4)

    out = pl.pallas_call(
        _fused_gathered_head_kernel,
        out_shape=jax.ShapeDtypeStruct((C, B, 1), jnp.float32),
        grid=(B // TB,),
        in_specs=[
            pl.BlockSpec((TB, H), lambda i: (i, 0)),          # features: row tile
            pl.BlockSpec((H, H), lambda i: (0, 0)),           # dense weight (resident)
            pl.BlockSpec((1, H), lambda i: (0, 0)),           # dense bias
            pl.BlockSpec((1, H), lambda i: (0, 0)),           # LayerNorm gamma
            pl.BlockSpec((1, H), lambda i: (0, 0)),           # LayerNorm beta
            pl.BlockSpec((C, TB, H), lambda i: (0, i, 0)),    # gathered decoder rows
            pl.BlockSpec((C, TB, 1), lambda i: (0, i, 0)),    # gathered decoder bias
        ],
        out_specs=pl.BlockSpec((C, TB, 1), lambda i: (0, i, 0)),
        compiler_params=pltpu.CompilerParams(
            dimension_semantics=("parallel",),                # megacore splits row tiles
            vmem_limit_bytes=vmem_limit),
        cost_estimate=cost,
    )(features, params["dense_w"], params["dense_b"],
      params["ln_gamma"], params["ln_beta"], w2gt, b2gt)
    return jnp.squeeze(out, axis=-1).T                                # [B, C]


# ---------------------------------------------------------------------------
# Kernels 2+3 (general path): full-vocab logits, decoder tiled over (vocab, rows).
# ---------------------------------------------------------------------------
def _hidden_kernel(x_ref, w1_ref, b1_ref, gamma_ref, beta_ref, h_ref):
    h = _hidden_from_features(x_ref[...], w1_ref[...], b1_ref[...],
                              gamma_ref[...], beta_ref[...])
    # Hand h off in bf16: halves its HBM writeback/readback, and the decoder
    # matmul consumes bf16 anyway.
    h_ref[...] = h.astype(h_ref.dtype)


def _decode_tile_kernel(h_ref, w2_ref, b2_ref, out_ref):
    # h tile: [TB, H] bf16 (no per-tile recast); w2 tile: [TN, H] bf16; b2: [1, TN]
    # dot_general contracts the rhs on dim 1 (h @ w2_tile.T on the MXU); the MXU
    # takes the transposed operand directly -- verify with pl.lower_as_mlir if a
    # vxpose ever shows up, and pre-transpose decoder_w to [H, V] in that case.
    logits = jax.lax.dot_general(
        h_ref[...], w2_ref[...],
        dimension_numbers=(((1,), (1,)), ((), ())),
        preferred_element_type=jnp.float32)
    out_ref[...] = logits + b2_ref[...]


def _hidden(features, params, row_tile=None):
    """dense + gelu + LayerNorm, computed once (bf16 output) so the vocab-tiled
    decode below never recomputes it."""
    B, H = features.shape
    TB = _pick_row_tile(B) if row_tile is None else row_tile
    assert B % TB == 0, (B, TB)
    vmem_limit = _vmem_limit_bytes()
    cost = pl.CostEstimate(
        flops=2 * B * H * H + 12 * B * H,
        transcendentals=B * H,
        bytes_accessed=H * H * 2 + B * H * 2 + (B * H + 3 * H) * 4)
    return pl.pallas_call(
        _hidden_kernel,
        out_shape=jax.ShapeDtypeStruct((B, H), jnp.bfloat16),
        grid=(B // TB,),
        in_specs=[
            pl.BlockSpec((TB, H), lambda i: (i, 0)),
            pl.BlockSpec((H, H), lambda i: (0, 0)),
            pl.BlockSpec((1, H), lambda i: (0, 0)),
            pl.BlockSpec((1, H), lambda i: (0, 0)),
            pl.BlockSpec((1, H), lambda i: (0, 0)),
        ],
        out_specs=pl.BlockSpec((TB, H), lambda i: (i, 0)),
        compiler_params=pltpu.CompilerParams(
            dimension_semantics=("parallel",),
            vmem_limit_bytes=vmem_limit),
        cost_estimate=cost,
    )(features, params["dense_w"], params["dense_b"],
      params["ln_gamma"], params["ln_beta"])


def lm_head_logits(features, params, tile_n=None, row_tile=None):
    """General full-vocab path: [B, H] -> [B, V] logits.

    The decoder weight (padded once at init to a 128-multiple vocab) is streamed
    from HBM in lane-dense vocab tiles with BlockSpec double-buffering; the grid
    is (vocab tiles, row tiles) with vocab outermost so the big weight is read
    once while the small bf16 h is re-streamed; both axes are 'parallel'."""
    B, H = features.shape
    Vp = params["decoder_w"].shape[0]
    V = int(params.get("vocab_size", Vp))
    h = _hidden(features, params, row_tile=row_tile)                  # [B, H] bf16

    vmem_limit = _vmem_limit_bytes()
    target_bytes = max(2 << 20, min(16 << 20, vmem_limit // 8))
    tn = _pick_vocab_tile(Vp, H, target_bytes) if tile_n is None else tile_n
    assert Vp % tn == 0 and tn % 128 == 0, (Vp, tn)
    TB = _pick_row_tile(B) if row_tile is None else row_tile
    assert B % TB == 0, (B, TB)
    bias2d = params["lm_bias"].reshape(1, Vp)

    cost = pl.CostEstimate(
        flops=2 * B * H * Vp,
        transcendentals=0,
        bytes_accessed=Vp * H * 2 + B * H * 2 * (Vp // tn) + (B * Vp + Vp) * 4)

    logits = pl.pallas_call(
        _decode_tile_kernel,
        out_shape=jax.ShapeDtypeStruct((B, Vp), jnp.float32),
        grid=(Vp // tn, B // TB),
        in_specs=[
            pl.BlockSpec((TB, H), lambda j, i: (i, 0)),     # h: bf16 row tile
            pl.BlockSpec((tn, H), lambda j, i: (j, 0)),     # decoder rows: streamed
            pl.BlockSpec((1, tn), lambda j, i: (0, j)),     # decoder bias tile
        ],
        out_specs=pl.BlockSpec((TB, tn), lambda j, i: (i, j)),   # lane-dense out tile
        compiler_params=pltpu.CompilerParams(
            dimension_semantics=("parallel", "parallel"),
            vmem_limit_bytes=vmem_limit),
        cost_estimate=cost,
    )(h, params["decoder_w"], bias2d)
    return logits[:, :V] if V != Vp else logits


# ---------------------------------------------------------------------------
# Loss + module forward (CrossEntropyLoss over the tiny [B, C] scores is JAX glue)
# ---------------------------------------------------------------------------
def cross_entropy_ignore_index(scores, labels, ignore_index=-1):
    """PyTorch CrossEntropyLoss(ignore_index=-1) semantics (mean over valid;
    NaN when every label is ignored, matching PyTorch's 0/0)."""
    valid = labels != ignore_index
    safe_labels = jnp.where(valid, labels, 0)
    logz = jax.scipy.special.logsumexp(scores, axis=-1)
    picked = jnp.take_along_axis(scores, safe_labels[:, None], axis=-1)[:, 0]
    nll = jnp.where(valid, logz - picked, 0.0)
    denom = jnp.sum(valid.astype(jnp.float32))
    return jnp.sum(nll) / denom


def bert_like_lm_model_head(sequence_output, choices_ids, gold_labels, params):
    prediction_scores = lm_head_prediction_scores(sequence_output, choices_ids, params)
    masked_lm_loss = cross_entropy_ignore_index(prediction_scores, gold_labels)
    return masked_lm_loss, prediction_scores


# ---------------------------------------------------------------------------
# Params / reference
# ---------------------------------------------------------------------------
def init_params(key, hidden_size, vocab_size):
    k1, k2, k3 = jax.random.split(key, 3)
    # dense.weight ~ N(0, 0.02), stored transposed as [in, out], bf16.
    dense_w = (0.02 * jax.random.normal(
        k1, (hidden_size, hidden_size), dtype=jnp.float32)).astype(jnp.bfloat16)
    # dense.bias keeps PyTorch Linear default init U(-1/sqrt(in), 1/sqrt(in)).
    bound = 1.0 / math.sqrt(hidden_size)
    dense_b = jax.random.uniform(k2, (1, hidden_size), jnp.float32, -bound, bound)
    ln_gamma = jnp.ones((1, hidden_size), jnp.float32)
    ln_beta = jnp.zeros((1, hidden_size), jnp.float32)
    # decoder.weight ~ N(0, 0.02), PyTorch [vocab, hidden] layout, bf16; padded
    # once to a 128-multiple vocab so the full-vocab path always gets lane-dense
    # streaming tiles (real BERT vocab 30522 -> 30720).
    vp = ((vocab_size + 127) // 128) * 128
    decoder_w = 0.02 * jax.random.normal(
        k3, (vocab_size, hidden_size), dtype=jnp.float32)
    if vp != vocab_size:
        decoder_w = jnp.concatenate(
            [decoder_w, jnp.zeros((vp - vocab_size, hidden_size), jnp.float32)], axis=0)
    decoder_w = decoder_w.astype(jnp.bfloat16)
    lm_bias = jnp.zeros((vp,), jnp.float32)
    return dict(dense_w=dense_w, dense_b=dense_b, ln_gamma=ln_gamma,
                ln_beta=ln_beta, decoder_w=decoder_w, lm_bias=lm_bias,
                vocab_size=vocab_size)


def reference_forward(features, choices_ids, gold_labels, params):
    """Pure-JAX reference mirroring the kernel's bf16-weight / f32-accum math."""
    V = int(params["vocab_size"])
    x = features.astype(jnp.bfloat16)
    h = jnp.dot(x, params["dense_w"],
                preferred_element_type=jnp.float32) + params["dense_b"]
    h = h * 0.5 * (1.0 + jax.lax.erf(h * _INV_SQRT2))
    mean = jnp.mean(h, axis=-1, keepdims=True)
    c = h - mean
    var = jnp.mean(c * c, axis=-1, keepdims=True)
    h = c * jax.lax.rsqrt(var + _LN_EPS) * params["ln_gamma"] + params["ln_beta"]
    logits = jnp.dot(h.astype(jnp.bfloat16), params["decoder_w"].T,
                     preferred_element_type=jnp.float32) + params["lm_bias"]
    logits = logits[:, :V]
    scores = jnp.take_along_axis(logits, choices_ids, axis=1)
    loss = cross_entropy_ignore_index(scores, gold_labels)
    return loss, scores, logits


if __name__ == "__main__":
    # Small shapes; V deliberately NOT a multiple of 128 to exercise vocab padding.
    B, H, V, C = 8, 128, 500, 4

    key = jax.random.PRNGKey(0)
    kp, kx, kc, kl = jax.random.split(key, 4)

    params = init_params(kp, H, V)
    sequence_output = jax.random.normal(kx, (B, H), dtype=jnp.float32)
    choices_ids = jax.random.randint(kc, (B, C), 0, V, dtype=jnp.int32)
    gold_labels = jax.random.randint(kl, (B,), 0, C, dtype=jnp.int32)
    gold_labels = gold_labels.at[0].set(-1)      # exercise ignore_index=-1

    # Primary path: fused gathered head (never builds the [B, V] logits).
    fwd = jax.jit(functools.partial(bert_like_lm_model_head, params=params))
    loss, prediction_scores = fwd(sequence_output, choices_ids, gold_labels)
    jax.block_until_ready((loss, prediction_scores))
    assert prediction_scores.shape == (B, C)
    assert loss.shape == ()

    # General path: full-vocab logits, vocab axis tiled over padded 128-multiples.
    logits_fn = jax.jit(functools.partial(lm_head_logits, params=params))
    logits_full = logits_fn(sequence_output)
    jax.block_until_ready(logits_full)
    assert logits_full.shape == (B, V)
    scores_full = jnp.take_along_axis(logits_full, choices_ids, axis=1)

    # Numerical sanity vs a pure-JAX reference (same bf16 weights).
    ref_loss, ref_scores, ref_logits = reference_forward(
        sequence_output, choices_ids, gold_labels, params)
    np.testing.assert_allclose(np.asarray(prediction_scores), np.asarray(ref_scores),
                               rtol=5e-2, atol=5e-3)
    np.testing.assert_allclose(np.asarray(logits_full), np.asarray(ref_logits),
                               rtol=5e-2, atol=5e-3)
    np.testing.assert_allclose(np.asarray(scores_full), np.asarray(prediction_scores),
                               rtol=5e-2, atol=5e-3)
    np.testing.assert_allclose(float(loss), float(ref_loss), rtol=5e-2, atol=5e-3)

    print("KERNEL_OK")
</pallas_src>

<mosaic_0001>
module attributes {stable_mosaic.version = 11 : i64} {
  func.func @_fused_gathered_head_kernel(%arg0: i32, %arg1: memref<8x128xf32, #tpu.memory_space<vmem>>, %arg2: memref<128x128xbf16, #tpu.memory_space<vmem>>, %arg3: memref<1x128xf32, #tpu.memory_space<vmem>>, %arg4: memref<1x128xf32, #tpu.memory_space<vmem>>, %arg5: memref<1x128xf32, #tpu.memory_space<vmem>>, %arg6: memref<4x8x128xbf16, #tpu.memory_space<vmem>>, %arg7: memref<4x8x1xf32, #tpu.memory_space<vmem>>, %arg8: memref<4x8x1xf32, #tpu.memory_space<vmem>>) attributes {dimension_semantics = [#tpu.dimension_semantics<parallel>], iteration_bounds = array<i64: 1>, scalar_prefetch = 0 : i64, scratch_operands = 0 : i64, tpu.core_type = #tpu.core_type<tc>, window_params = [{transform_indices = @transform_0, window_bounds = array<i64: 8, 128>}, {pipeline_mode = #tpu.pipeline_mode<synchronous>, transform_indices = @transform_1, window_bounds = array<i64: 128, 128>}, {pipeline_mode = #tpu.pipeline_mode<synchronous>, transform_indices = @transform_2, window_bounds = array<i64: 1, 128>}, {pipeline_mode = #tpu.pipeline_mode<synchronous>, transform_indices = @transform_3, window_bounds = array<i64: 1, 128>}, {pipeline_mode = #tpu.pipeline_mode<synchronous>, transform_indices = @transform_4, window_bounds = array<i64: 1, 128>}, {transform_indices = @transform_5, window_bounds = array<i64: 4, 8, 128>}, {transform_indices = @transform_6, window_bounds = array<i64: 4, 8, 1>}, {transform_indices = @transform_7, window_bounds = array<i64: 4, 8, 1>}]} {
    %c0 = arith.constant 0 : index
    %c0_0 = arith.constant 0 : index
    %0 = vector.load %arg1[%c0, %c0_0] : memref<8x128xf32, #tpu.memory_space<vmem>>, vector<8x128xf32>
    %c0_1 = arith.constant 0 : index
    %c0_2 = arith.constant 0 : index
    %1 = vector.load %arg2[%c0_1, %c0_2] : memref<128x128xbf16, #tpu.memory_space<vmem>>, vector<128x128xbf16>
    %c0_3 = arith.constant 0 : index
    %c0_4 = arith.constant 0 : index
    %2 = vector.load %arg3[%c0_3, %c0_4] : memref<1x128xf32, #tpu.memory_space<vmem>>, vector<1x128xf32>
    %c0_5 = arith.constant 0 : index
    %c0_6 = arith.constant 0 : index
    %3 = vector.load %arg4[%c0_5, %c0_6] : memref<1x128xf32, #tpu.memory_space<vmem>>, vector<1x128xf32>
    %c0_7 = arith.constant 0 : index
    %c0_8 = arith.constant 0 : index
    %4 = vector.load %arg5[%c0_7, %c0_8] : memref<1x128xf32, #tpu.memory_space<vmem>>, vector<1x128xf32>
    %5 = arith.truncf %0 : vector<8x128xf32> to vector<8x128xbf16>
    %cst = arith.constant dense<0.000000e+00> : vector<8x128xf32>
    %6 = tpu.matmul %5, %1, %cst {dimension_numbers = #tpu.dot_dimension_numbers<[1], [0], [0], [1], [0, 0, 1, 1], [], []>} : vector<8x128xbf16>, vector<128x128xbf16>, vector<8x128xf32> -> vector<8x128xf32>
    %7 = vector.broadcast %2 : vector<1x128xf32> to vector<8x128xf32>
    %8 = arith.addf %6, %7 : vector<8x128xf32>
    %cst_9 = arith.constant 5.000000e-01 : f32
    %9 = vector.broadcast %cst_9 : f32 to vector<8x128xf32>
    %10 = arith.mulf %8, %9 : vector<8x128xf32>
    %cst_10 = arith.constant 0.707106769 : f32
    %11 = vector.broadcast %cst_10 : f32 to vector<8x128xf32>
    %12 = arith.mulf %8, %11 : vector<8x128xf32>
    %13 = math.erf %12 : vector<8x128xf32>
    %cst_11 = arith.constant 1.000000e+00 : f32
    %14 = vector.broadcast %cst_11 : f32 to vector<8x128xf32>
    %15 = arith.addf %14, %13 : vector<8x128xf32>
    %16 = arith.mulf %10, %15 : vector<8x128xf32>
    %cst_12 = arith.constant dense<0.000000e+00> : vector<8xf32>
    %17 = vector.multi_reduction <add>, %16, %cst_12 [1] : vector<8x128xf32> to vector<8xf32>
    %18 = vector.shape_cast %17 : vector<8xf32> to vector<8x1xf32>
    %cst_13 = arith.constant 1.280000e+02 : f32
    %19 = vector.broadcast %cst_13 : f32 to vector<8x1xf32>
    %20 = arith.divf %18, %19 : vector<8x1xf32>
    %21 = vector.broadcast %20 : vector<8x1xf32> to vector<8x128xf32>
    %22 = arith.subf %16, %21 : vector<8x128xf32>
    %23 = arith.mulf %22, %22 : vector<8x128xf32>
    %cst_14 = arith.constant dense<0.000000e+00> : vector<8xf32>
    %24 = vector.multi_reduction <add>, %23, %cst_14 [1] : vector<8x128xf32> to vector<8xf32>
    %25 = vector.shape_cast %24 : vector<8xf32> to vector<8x1xf32>
    %cst_15 = arith.constant 1.280000e+02 : f32
    %26 = vector.broadcast %cst_15 : f32 to vector<8x1xf32>
    %27 = arith.divf %25, %26 : vector<8x1xf32>
    %cst_16 = arith.constant 9.99999974E-6 : f32
    %28 = vector.broadcast %cst_16 : f32 to vector<8x1xf32>
    %29 = arith.addf %27, %28 : vector<8x1xf32>
    %30 = math.rsqrt %29 : vector<8x1xf32>
    %31 = vector.broadcast %30 : vector<8x1xf32> to vector<8x128xf32>
    %32 = arith.mulf %22, %31 : vector<8x128xf32>
    %33 = vector.broadcast %3 : vector<1x128xf32> to vector<8x128xf32>
    %34 = arith.mulf %32, %33 : vector<8x128xf32>
    %35 = vector.broadcast %4 : vector<1x128xf32> to vector<8x128xf32>
    %36 = arith.addf %34, %35 : vector<8x128xf32>
    %c0_17 = arith.constant 0 : index
    %c0_18 = arith.constant 0 : index
    %c0_19 = arith.constant 0 : index
    %37 = vector.load %arg6[%c0_17, %c0_18, %c0_19] : memref<4x8x128xbf16, #tpu.memory_space<vmem>>, vector<4x8x128xbf16>
    %38 = arith.extf %37 : vector<4x8x128xbf16> to vector<4x8x128xf32>
    %39 = vector.shape_cast %36 : vector<8x128xf32> to vector<1x8x128xf32>
    %40 = vector.broadcast %39 : vector<1x8x128xf32> to vector<4x8x128xf32>
    %41 = arith.mulf %38, %40 : vector<4x8x128xf32>
    %cst_20 = arith.constant dense<0.000000e+00> : vector<4x8xf32>
    %42 = vector.multi_reduction <add>, %41, %cst_20 [2] : vector<4x8x128xf32> to vector<4x8xf32>
    %43 = vector.shape_cast %42 : vector<4x8xf32> to vector<4x8x1xf32>
    %c0_21 = arith.constant 0 : index
    %c0_22 = arith.constant 0 : index
    %c0_23 = arith.constant 0 : index
    %44 = vector.load %arg7[%c0_21, %c0_22, %c0_23] : memref<4x8x1xf32, #tpu.memory_space<vmem>>, vector<4x8x1xf32>
    %45 = arith.addf %43, %44 : vector<4x8x1xf32>
    %c0_24 = arith.constant 0 : index
    %c0_25 = arith.constant 0 : index
    %c0_26 = arith.constant 0 : index
    %46 = vector.load %arg8[%c0_24, %c0_25, %c0_26] : memref<4x8x1xf32, #tpu.memory_space<vmem>>, vector<4x8x1xf32>
    tpu.vector_store %arg8[%c0_24, %c0_25, %c0_26], %45 {strides = array<i32>} : memref<4x8x1xf32, #tpu.memory_space<vmem>>, vector<4x8x1xf32>,
    return
  }
  func.func @transform_0(%arg0: i32) -> (i32, i32) {
    %c0_i32 = arith.constant 0 : i32
    %c0_i32_0 = arith.constant 0 : i32
    return %arg0, %c0_i32 : i32, i32
  }
  func.func @transform_1(%arg0: i32) -> (i32, i32) {
    %c0_i32 = arith.constant 0 : i32
    %c0_i32_0 = arith.constant 0 : i32
    %c0_i32_1 = arith.constant 0 : i32
    return %c0_i32, %c0_i32_0 : i32, i32
  }
  func.func @transform_2(%arg0: i32) -> (i32, i32) {
    %c0_i32 = arith.constant 0 : i32
    %c0_i32_0 = arith.constant 0 : i32
    %c0_i32_1 = arith.constant 0 : i32
    return %c0_i32, %c0_i32_0 : i32, i32
  }
  func.func @transform_3(%arg0: i32) -> (i32, i32) {
    %c0_i32 = arith.constant 0 : i32
    %c0_i32_0 = arith.constant 0 : i32
    %c0_i32_1 = arith.constant 0 : i32
    return %c0_i32, %c0_i32_0 : i32, i32
  }
  func.func @transform_4(%arg0: i32) -> (i32, i32) {
    %c0_i32 = arith.constant 0 : i32
    %c0_i32_0 = arith.constant 0 : i32
    %c0_i32_1 = arith.constant 0 : i32
    return %c0_i32, %c0_i32_0 : i32, i32
  }
  func.func @transform_5(%arg0: i32) -> (i32, i32, i32) {
    %c0_i32 = arith.constant 0 : i32
    %c0_i32_0 = arith.constant 0 : i32
    %c0_i32_1 = arith.constant 0 : i32
    return %c0_i32, %arg0, %c0_i32_0 : i32, i32, i32
  }
  func.func @transform_6(%arg0: i32) -> (i32, i32, i32) {
    %c0_i32 = arith.constant 0 : i32
    %c0_i32_0 = arith.constant 0 : i32
    %c0_i32_1 = arith.constant 0 : i32
    return %c0_i32, %arg0, %c0_i32_0 : i32, i32, i32
  }
  func.func @transform_7(%arg0: i32) -> (i32, i32, i32) {
    %c0_i32 = arith.constant 0 : i32
    %c0_i32_0 = arith.constant 0 : i32
    %c0_i32_1 = arith.constant 0 : i32
    return %c0_i32, %arg0, %c0_i32_0 : i32, i32, i32
  }
}

</mosaic_0001>

<bundles_post_ra>
// kernel: bert_like_lm_model_head.1
= control target key start
LH: loop header
LB: loop body
LE: loop exit
PB: predicated region body
PF: predicated region fallthrough
CT: control target
= control target key end

     0   :  { %v287_v53 = vmov 128.0   ;;  %vm218_vm8 = vcmask 7168   ;;  %s394_s1 = inlined_call_operand.vmem [shape: bf16[128,128], index: 1, kind: input, shape index: {}]   ;;  %s395_s2 = inlined_call_operand.vmem [shape: f32[1,128], index: 2, kind: input, shape index: {}]   ;;  %s396_s0 = inlined_call_operand.vmem [shape: f32[8,128], index: 0, kind: input, shape index: {}]   ;;  %s397_s3 = inlined_call_operand.vmem [shape: f32[1,128], index: 3, kind: input, shape index: {}]   ;;  %s398_s4 = inlined_call_operand.vmem [shape: f32[1,128], index: 4, kind: input, shape index: {}]   ;;  %s399_s5 = inlined_call_operand.vmem [shape: bf16[4,8,128], index: 5, kind: input, shape index: {}]   ;;  %s400_s6 = inlined_call_operand.vmem [shape: f32[4,8,1], index: 6, kind: input, shape index: {}]   ;;  %s401_s7 = inlined_call_operand.vmem [shape: f32[4,8,1], index: 7, kind: output, shape index: {}]  }
   0x1   :  { %v267_v0 = vld [vmem:[%s394_s1 + $0x38] sm:$0xff]  ;;  %v266_v1 = vld [vmem:[%s394_s1 + $0x30] sm:$0xff]  ;;  %v265_v2 = vld [vmem:[%s394_s1 + $0x28] sm:$0xff] }
   0x2   :  { %98 = vmatpush.bf16.msra.mxu0 %v267_v0  ;;  %v264_v3 = vld [vmem:[%s394_s1 + $0x20] sm:$0xff]  ;;  %v263_v4 = vld [vmem:[%s394_s1 + $0x18] sm:$0xff]  ;;  %v262_v5 = vld [vmem:[%s394_s1 + $0x10] sm:$0xff] }
   0x3   :  { %v261_v6 = vld [vmem:[%s394_s1 + $0x8] sm:$0xff]  ;;  %v260_v7 = vld [vmem:[%s394_s1] sm:$0xff] }
   0x4   :  { %v26_v8 = vld [vmem:[%s396_s0] sm:$0xff] }
   0x5   :  { %v46_v9 = vpack.c.bf16 %v26_v8, %v26_v8  ;;  %v278_v10 = vld [vmem:[%s395_s2] ss:$0 sm:$0xff] }
   0x6   :  { %99 = vmatpush.bf16.msra.mxu0 %v266_v1 }
   0xa   :  { %100 = vmatpush.bf16.msra.mxu0 %v265_v2 }
   0xe   :  { %101 = vmatpush.bf16.msra.mxu0 %v264_v3 }
  0x12   :  { %102 = vmatpush.bf16.msra.mxu0 %v263_v4 }
  0x16   :  { %103 = vmatpush.bf16.msra.mxu0 %v262_v5 }
  0x1a   :  { %104 = vmatpush.bf16.msra.mxu0 %v261_v6 }
  0x1e   :  { %105 = vmatpush.bf16.msra.mxu0 %v260_v7 }
  0x21   :  { %106 = vmatmul.bf16.vlgmr.msra.gmra.mxu0 %v46_v9  ;;  %v279_v9 = vld [vmem:[%s397_s3] ss:$0 sm:$0xff] }
  0x9e   :  { %v107_v11 = vpop.f32.mrf.mxu0 }
  0x9f   :  { %v108_v12 = vadd.f32 %v278_v10, %v107_v11  ;;  %v276_v11 = vld [vmem:[%s399_s5 + $0x8] sm:$0xff]  }
  0xa1   :  { %v112_v13 = vmul.f32 0.70710677, %v108_v12  ;;  %v111_v50 = vmul.f32 0.5, %v108_v12  ;;  %v269_v12 = vld [vmem:[%s399_s5] sm:$0xff]  }
  0xa3   :  { %v113_v14 = vmul.f32 %v112_v13, %v112_v13 }
  0xa5   :  { %v114_v15 = vmin.f32 %v113_v14, 16.0  ;;  %v280_v14 = vld [vmem:[%s398_s4] ss:$0 sm:$0xff] }
  0xa6   :  { %v109_v16 = vpop.f32.mrf.mxu0 }
  0xa7   :  { %v115_v17 = vmul.f32 2.1237322e-06, %v114_v15  ;;  %v126_v18 = vmul.f32 3.8918573e-05, %v114_v15  ;;  %v274_v16 = vunpack.c.l.bf16 %v276_v11 }
  0xa9   :  { %v116_v19 = vadd.f32 0.00028619796, %v115_v17  ;;  %v127_v20 = vadd.f32 0.001143296, %v126_v18  ;;  %v270_v17 = vunpack.c.l.bf16 %v269_v12 }
  0xab   :  { %v117_v21 = vmul.f32 %v116_v19, %v114_v15  ;;  %v128_v22 = vmul.f32 %v127_v20, %v114_v15 }
  0xad   :  { %v129_v23 = vadd.f32 0.014752088, %v128_v22  ;;  %v118_v24 = vadd.f32 0.0036580483, %v117_v21  ;;  %v275_v21 = vunpack.c.h.bf16 %v276_v11  ;;  %v271_v22 = vunpack.c.h.bf16 %v269_v12 }
  0xaf   :  { %v130_v25 = vmul.f32 %v129_v23, %v114_v15  ;;  %v119_v27 = vmul.f32 %v118_v24, %v114_v15 }
  0xb1   :  { %v131_v26 = vadd.f32 0.112945676, %v130_v25  ;;  %v120_v30 = vadd.f32 0.05243302, %v119_v27  ;;  %v212_v25 = vld [vmem:[%s400_s6 + $0x10] sm:$0xff] }
  0xb3   :  { %v132_v28 = vmul.f32 %v131_v26, %v114_v15  ;;  %v121_v33 = vmul.f32 %v120_v30, %v114_v15  ;;  %v210_v26 = vld [vmem:[%s400_s6] sm:$0xff] }
  0xb5   :  { %v133_v29 = vadd.f32 0.4994258, %v132_v28  ;;  %v122_v34 = vadd.f32 0.18741608, %v121_v33 }
  0xb7   :  { %v134_v31 = vmul.f32 %v133_v29, %v114_v15  ;;  %v123_v36 = vmul.f32 %v122_v34, %v114_v15 }
  0xb9   :  { %v135_v32 = vadd.f32 1.0, %v134_v31  ;;  %v124_v40 = vadd.f32 1.1283791, %v123_v36  ;;  %v213_v31 = vld [vmem:[%s400_s6 + $0x18] sm:$0xff] }
  0xbb   :  { %281 = vrcp.f32 %v135_v32  ;;  %v147_v39 = vand.u32 2147483648, %v135_v32  ;;  %v145_v42 = vand.u32 2147483647, %v135_v32  ;;  %vm141_vm1 = vweird.f32 %v135_v32 }
  0xbc   :  { %v125_v45 = vmul.f32 %v124_v40, %v112_v13  ;;  %283 = vrcp.f32 %v287_v53 }
  0xbd   :  { %v148_v44 = vor.u32 1.1754944e-38, %v147_v39  ;;  %vm146_vm3 = vcmp.eq.f32.partialorder %v145_v42, 8.507059e+37 }
  0xc1   :  { %v282_v35 = vpop.eup %281 }
  0xc2   :  { %v137_v37 = vmul.f32 %v282_v35, %v135_v32  ;;  %vm142_vm0 = vweird.f32 %v282_v35  ;;  %v284_v54 = vpop.eup %283  ;;  %v211_v32 = vld [vmem:[%s400_s6 + $0x8] sm:$0xff] }
  0xc3   :  { %vm143_vm2 = vmor %vm141_vm1, %vm142_vm0  ;;  %v158_v55 = vmul.f32 128.0, %v284_v54  ;;  %vm162_vm4 = vweird.f32 %v284_v54 }
  0xc4   :  { %v138_v38 = vsub.f32 1.0, %v137_v37 }
  0xc5   :  { %v159_v56 = vsub.f32 1.0, %v158_v55 }
  0xc6   :  { %v139_v41 = vmul.f32 %v282_v35, %v138_v38 }
  0xc7   :  { %v160_v57 = vmul.f32 %v284_v54, %v159_v56 }
  0xc8   :  { %v140_v43 = vadd.f32 %v282_v35, %v139_v41 }
  0xc9   :  { %v161_v58 = vadd.f32 %v284_v54, %v160_v57 }
  0xca   :  { %v144_v46 = vsel %vm143_vm2, %v282_v35, %v140_v43 }
  0xcb   :  { %v149_v47 = vsel %vm146_vm3, %v148_v44, %v144_v46  ;;  %v163_v59 = vsel %vm162_vm4, %v284_v54, %v161_v58 }
  0xcc   :  { %v150_v48 = vmul.f32 %v149_v47, %v125_v45 }
  0xce   :  { %v259_v49 = vclamps-f32 %v150_v48, 1.0 }
  0xd0   :  { %v153_v51 = vadd.f32 1.0, %v259_v49 }
  0xd2   :  { %v154_v52 = vmul.f32 %v153_v51, %v111_v50 }
  0xd4   :  { %155 = vadd.xlane.f32.xlu0 %v154_v52 }
 0x147   :  { %v156_v60 = vpop.xlane.xlu0 %155 }
 0x148   :  { %v164_v61 = vmul.f32 %v163_v59, %v156_v60 }
 0x14a   :  { %v165_v62 = vsub.f32 %v154_v52, %v164_v61 }
 0x14c   :  { %v166_v63 = vmul.f32 %v165_v62, %v165_v62 }
 0x14e   :  { %167 = vadd.xlane.f32.xlu0 %v166_v63 }
 0x1c1   :  { %v168_v0 = vpop.xlane.xlu0 %167 }
 0x1c2   :  { %v169_v1 = vmul.f32 %v168_v0, %v163_v59 }
 0x1c4   :  { %v170_v2 = vadd.f32 1e-05, %v169_v1 }
 0x1c6   :  { %285 = vrsqrt.f32 %v170_v2  ;;  %vm177_vm6 = vweird.f32 %v170_v2 }
 0x1cc   :  { %v286_v3 = vpop.eup %285 }
 0x1cd   :  { %v172_v4 = vmul.f32 %v286_v3, %v170_v2  ;;  %vm178_vm5 = vweird.f32 %v286_v3 }
 0x1ce   :  { %vm179_vm7 = vmor %vm177_vm6, %vm178_vm5 }
 0x1cf   :  { %v173_v5 = vmul.f32 %v286_v3, %v172_v4 }
 0x1d1   :  { %v174_v6 = vmul.f32 0.5, %v173_v5 }
 0x1d3   :  { %v175_v7 = vsub.f32 1.5, %v174_v6 }
 0x1d5   :  { %v176_v8 = vmul.f32 %v286_v3, %v175_v7 }
 0x1d7   :  { %v180_v10 = vsel %vm179_vm7, %v286_v3, %v176_v8 }
 0x1d8   :  { %v181_v13 = vmul.f32 %v180_v10, %v165_v62 }
 0x1da   :  { %v185_v15 = vmul.f32 %v279_v9, %v181_v13 }
 0x1dc   :  { %v189_v18 = vadd.f32 %v280_v14, %v185_v15 }
 0x1de   :  { %v200_v19 = vmul.f32 %v274_v16, %v189_v18  ;;  %v198_v20 = vmul.f32 %v270_v17, %v189_v18  ;;  %v201_v23 = vmul.f32 %v275_v21, %v189_v18  ;;  %v199_v24 = vmul.f32 %v271_v22, %v189_v18 }
 0x1e0   :  { %206 = vadd.xlane.f32.xlu2 %v200_v19  ;;  %202 = vadd.xlane.f32.xlu1 %v198_v20 }
 0x1e8   :  { %208 = vadd.xlane.f32.xlu2 %v201_v23  ;;  %204 = vadd.xlane.f32.xlu1 %v199_v24 }
 0x253   :  { %v207_v27 = vpop.xlane.xlu2 %206  ;;  %v203_v28 = vpop.xlane.xlu1 %202 }
 0x254   :  { %v216_v29 = vadd.f32 %v212_v25, %v207_v27  ;;  %v214_v30 = vadd.f32 %v210_v26, %v203_v28 }
 0x256   :  { %221 = vst.msk [vmem:[%s401_s7 + $0x10] sm:$0xff] %vm218_vm8, %v216_v29 }
 0x257   :  { %219 = vst.msk [vmem:[%s401_s7] sm:$0xff] %vm218_vm8, %v214_v30 }
 0x25b   :  { %v209_v33 = vpop.xlane.xlu2 %208  ;;  %v205_v34 = vpop.xlane.xlu1 %204 }
 0x25c   :  { %v217_v35 = vadd.f32 %v213_v31, %v209_v33  ;;  %v215_v36 = vadd.f32 %v211_v32, %v205_v34 }
 0x25e   :  { %222 = vst.msk [vmem:[%s401_s7 + $0x18] sm:$0xff] %vm218_vm8, %v217_v35 }
 0x25f   :  { %220 = vst.msk [vmem:[%s401_s7 + $0x8] sm:$0xff] %vm218_vm8, %v215_v36 }

</bundles_post_ra>
